<compile_context>
chip_gen: v6e
topology: v6e:2x2x1
jax: 0.10.0
libtpu: 0.0.40
codegen_flags: <defaults>
</compile_context>

<pallas_src>
import math

import jax
import jax.numpy as jnp
from jax.experimental import pallas as pl
from jax.experimental.pallas import tpu as pltpu


def _dma_copy_kernel(x_hbm, o_hbm, sem):
    # One whole-array HBM -> HBM DMA: pure data movement at the HBM roofline.
    cp = pltpu.make_async_copy(x_hbm, o_hbm, sem)
    cp.start()
    cp.wait()


def _pallas_materialize(x):
    """Return a freshly materialized copy of `x` via a single HBM->HBM DMA."""
    total = math.prod(x.shape)
    if total == 0:
        # Nothing to copy; avoid a zero-extent DMA.
        return x

    itemsize = jnp.dtype(x.dtype).itemsize
    return pl.pallas_call(
        _dma_copy_kernel,
        out_shape=jax.ShapeDtypeStruct(x.shape, x.dtype),
        in_specs=[pl.BlockSpec(memory_space=pl.ANY)],
        out_specs=pl.BlockSpec(memory_space=pl.ANY),
        scratch_shapes=[pltpu.SemaphoreType.DMA(())],
        cost_estimate=pl.CostEstimate(
            flops=0,
            transcendentals=0,
            bytes_accessed=2 * total * itemsize,  # read + write, exactly.
        ),
    )(x)


class Reshape:
    """JAX/Pallas equivalent of the PyTorch Reshape module."""

    def __init__(self, args):
        # args: iterable of ints, the target shape excluding the batch dim.
        self.ex_shape = tuple(int(a) for a in args)

    def __call__(self, inputs, materialize=False):
        shape = (inputs.shape[0],) + self.ex_shape
        if not materialize:
            # Metadata-only: identical element order to torch .view on a
            # contiguous tensor.  No HBM traffic, no kernel launch.
            return jnp.reshape(inputs, shape)
        # Optional materialized path: one HBM->HBM DMA copy, then the
        # metadata-only shape change.
        # TODO(synk): if the copy should replace the input buffer in place,
        # add input_output_aliases={0: 0} at a jit boundary that donates `x`.
        return jnp.reshape(_pallas_materialize(inputs), shape)


if __name__ == "__main__":
    key = jax.random.PRNGKey(0)
    # Small NCHW input consistent with a conv-style pipeline: (B, C, H, W)
    x = jax.random.normal(key, (2, 4, 16, 16), dtype=jnp.float32)

    mod = Reshape((16, 64))  # (B, 4, 16, 16) -> (B, 16, 64)

    # Default (recommended) path: metadata-only reshape.
    y_meta = jax.block_until_ready(mod(x))

    # Materialized path: exercises the single-DMA Pallas copy kernel on TPU.
    y_pallas = jax.block_until_ready(mod(x, materialize=True))

    # Reference: row-major reshape == torch .view on contiguous tensors.
    y_ref = jnp.reshape(x, (x.shape[0], 16, 64))

    assert y_meta.shape == (2, 16, 64), y_meta.shape
    assert y_pallas.shape == (2, 16, 64), y_pallas.shape
    assert y_meta.dtype == x.dtype and y_pallas.dtype == x.dtype
    assert bool(jnp.array_equal(y_meta, y_ref))
    assert bool(jnp.array_equal(y_pallas, y_ref))

    print("KERNEL_OK")
</pallas_src>

<mosaic_0001>
module attributes {stable_mosaic.version = 11 : i64} {
  func.func @_dma_copy_kernel(%arg0: memref<2x4x16x16xf32, #tpu.memory_space<any>>, %arg1: memref<2x4x16x16xf32, #tpu.memory_space<any>>, %arg2: memref<!tpu.dma_semaphore, #tpu.memory_space<semaphore_mem>>) attributes {dimension_semantics = [], scalar_prefetch = 0 : i64, scratch_operands = 1 : i64, tpu.core_type = #tpu.core_type<tc>} {
    tpu.enqueue_dma source(%arg0 : memref<2x4x16x16xf32, #tpu.memory_space<any>>) target(%arg1 : memref<2x4x16x16xf32, #tpu.memory_space<any>>) target_semaphore(%arg2 : memref<!tpu.dma_semaphore, #tpu.memory_space<semaphore_mem>>)
    tpu.wait_dma2 semaphore(%arg2 : memref<!tpu.dma_semaphore, #tpu.memory_space<semaphore_mem>>) src(%arg0 : memref<2x4x16x16xf32, #tpu.memory_space<any>>) dst(%arg1 : memref<2x4x16x16xf32, #tpu.memory_space<any>>)
    return
  }
}

</mosaic_0001>

<bundles_post_ra>
// kernel: tpu_custom_call.1
= control target key start
LH: loop header
LB: loop body
LE: loop exit
PB: predicated region body
PF: predicated region fallthrough
CT: control target
= control target key end

     0   :  { %s30_s6 = smov [#allocation2]   ;;  %s31_s7 = smov 131072   ;;  %s49_s0 = inlined_call_operand.hbm [shape: f32[2,4,16,16], index: 0, kind: input, shape index: {}]   ;;  %s50_s1 = inlined_call_operand.hbm [shape: f32[2,4,16,16], index: 1, kind: output, shape index: {}]  }
   0x1   :  { %s32_s8 = smov 0  }
   0x2   :  { %12 = dma.general %s49_s0, 2048, %s50_s1, %s30_s6, %s31_s7, [#allocation4], %s32_s8, 0  }
   0x3   :  { %28 = dma.done.wait [#allocation2], 2048 }
   0x4   :  { %29 = vsyncadd [#allocation2], 4294965248 }
   0x5   :  { %18 = vsyncmov [#allocation2] }
   0x8   :  { %s19_s13 = vpop.sfrf %18 }
   0x9   :  { %p24_p0 = scmp.ne.s32.totalorder %s19_s13, 0 }
   0xb   :  { %23 = shalt.err (%p24_p0)  }

</bundles_post_ra>
